<compile_context>
chip_gen: v5e
topology: v5e:2x2
jax: 0.10.0
libtpu: 0.0.40
codegen_flags: <defaults>
</compile_context>

<pallas_src>
import functools

import jax
import jax.numpy as jnp
from jax.experimental import pallas as pl
from jax.experimental.pallas import tpu as pltpu


def _round_up(a: int, b: int) -> int:
    return (a + b - 1) // b * b


def _mask_to_value_kernel(x_ref, m_ref, o_ref, *, value):
    # x_ref/o_ref: (TB, TC); m_ref: (1, TC) int8, broadcast over the TB rows.
    x = x_ref[...]
    keep = m_ref[...] != 0  # (1, TC) bool, broadcasts over rows
    # Scalar (weak-typed) fill value: no full fill tile is materialized and the
    # select stays in x's dtype end-to-end (no implicit f32 upcast for bf16).
    o_ref[...] = jnp.where(keep, x, value)


def mask_to_value(x, mask, value=float("-inf")):
    """Pallas equivalent of x.masked_fill(mask[:, :, :S, :C] == 0, value).

    x:    (N, H, S, C) floating-point array (value defaults to -inf => float only).
    mask: (1, 1, T_s, T_c) int/bool buffer with T_s >= S, T_c >= C.
    """
    n, h, s, c = x.shape
    bh, sc = n * h, s * c

    itemsize = jnp.dtype(x.dtype).itemsize
    sublane = {4: 8, 2: 16, 1: 32}.get(itemsize, 8)  # (8,128) f32 / (16,128) bf16
    lane = 128

    # Tile sizes: lane-dense last dim (multiple of 128, up to 2048 lanes) and a
    # row tile up to 256.  Largest tile (256 x 2048 f32) is 2 MiB; with x + out
    # double-buffered that is ~8 MiB of VMEM -> fits every generation's scoped
    # budget, including v7x (64 MiB physical / 32 MiB default scoped).
    tc = min(_round_up(sc, lane), 2048)
    sc_pad = _round_up(sc, tc)
    tb = min(_round_up(bh, sublane), 256)
    bh_pad = _round_up(bh, tb)

    x2d = x.reshape(bh, sc)
    # 1-byte mask (nonzero == keep) => negligible mask HBM traffic.
    m2d = (mask[0, 0, :s, :c] != 0).astype(jnp.int8).reshape(1, sc)

    if sc_pad != sc:
        x2d = jnp.pad(x2d, ((0, 0), (0, sc_pad - sc)))
        # Padding lanes marked "keep"; they are sliced off afterwards anyway.
        m2d = jnp.pad(m2d, ((0, 0), (0, sc_pad - sc)), constant_values=1)
    if bh_pad != bh:
        x2d = jnp.pad(x2d, ((0, bh_pad - bh), (0, 0)))

    # Grid: column tiles OUTER, row tiles INNER -> mask block index (0, j) is
    # unchanged across the inner axis, so it is not re-DMA'd per row tile.
    grid = (sc_pad // tc, bh_pad // tb)

    out2d = pl.pallas_call(
        functools.partial(_mask_to_value_kernel, value=value),
        out_shape=jax.ShapeDtypeStruct((bh_pad, sc_pad), x.dtype),
        grid_spec=pltpu.PrefetchScalarGridSpec(
            num_scalar_prefetch=0,
            grid=grid,
            in_specs=[
                pl.BlockSpec((tb, tc), lambda j, i: (i, j)),
                pl.BlockSpec((1, tc), lambda j, i: (0, j)),
            ],
            out_specs=pl.BlockSpec((tb, tc), lambda j, i: (i, j)),
        ),
        compiler_params=pltpu.CompilerParams(
            dimension_semantics=("parallel", "parallel"),
            # Explicit scoped-VMEM budget; safe on v5e/v6e (128 MiB physical)
            # and v7x (64 MiB physical), with plenty of headroom over the
            # ~8 MiB of double-buffered tiles used here.
            vmem_limit_bytes=32 * 1024 * 1024,
        ),
    )(x2d, m2d)

    return out2d[:bh, :sc].reshape(n, h, s, c)


if __name__ == "__main__":
    key = jax.random.PRNGKey(0)

    def reference(x, mask, value):
        s, c = x.shape[-2], x.shape[-1]
        return jnp.where(mask[:, :, :s, :c] == 0, value, x)

    # Registered mask buffer: causal (1, 1, T, T), larger than the sequence,
    # sliced inside the forward exactly like the PyTorch module does.
    n_tokens = 32
    mask = jnp.tril(jnp.ones((n_tokens, n_tokens), dtype=jnp.int32))
    mask = mask.reshape(1, 1, n_tokens, n_tokens)

    k1, k2 = jax.random.split(key)

    # Case 1: f32, lane-dense after the (S, C) -> S*C collapse (16*16 = 256).
    x1 = jax.random.normal(k1, (2, 4, 16, 16), dtype=jnp.float32)
    out1 = jax.block_until_ready(mask_to_value(x1, mask))
    ref1 = reference(x1, mask, float("-inf"))
    assert out1.shape == x1.shape
    assert bool(jnp.array_equal(out1, ref1))

    # Case 2: bf16 + padding path (8*8 = 64 lanes -> padded to 128; rows -> 16).
    x2 = jax.random.normal(k2, (2, 4, 8, 8), dtype=jnp.bfloat16)
    out2 = jax.block_until_ready(mask_to_value(x2, mask))
    ref2 = reference(x2, mask, float("-inf"))
    assert out2.shape == x2.shape
    assert bool(jnp.array_equal(out2, ref2))

    print("KERNEL_OK")
</pallas_src>

<mosaic_0001>
module attributes {stable_mosaic.version = 11 : i64} {
  func.func @_mask_to_value_kernel(%arg0: i32, %arg1: i32, %arg2: memref<8x256xf32, #tpu.memory_space<vmem>>, %arg3: memref<1x256xi8, #tpu.memory_space<vmem>>, %arg4: memref<8x256xf32, #tpu.memory_space<vmem>>) attributes {dimension_semantics = [#tpu.dimension_semantics<parallel>, #tpu.dimension_semantics<parallel>], iteration_bounds = array<i64: 1, 1>, scalar_prefetch = 0 : i64, scratch_operands = 0 : i64, tpu.core_type = #tpu.core_type<tc>, window_params = [{transform_indices = @transform_0, window_bounds = array<i64: 8, 256>}, {transform_indices = @transform_1, window_bounds = array<i64: 1, 256>}, {transform_indices = @transform_2, window_bounds = array<i64: 8, 256>}]} {
    %c0 = arith.constant 0 : index
    %c0_0 = arith.constant 0 : index
    %0 = vector.load %arg2[%c0, %c0_0] : memref<8x256xf32, #tpu.memory_space<vmem>>, vector<8x256xf32>
    %c0_1 = arith.constant 0 : index
    %c0_2 = arith.constant 0 : index
    %1 = vector.load %arg3[%c0_1, %c0_2] : memref<1x256xi8, #tpu.memory_space<vmem>>, vector<1x256xi8>
    %c0_i8 = arith.constant 0 : i8
    %2 = vector.broadcast %c0_i8 : i8 to vector<1x256xi8>
    %3 = arith.cmpi ne, %1, %2 : vector<1x256xi8>
    %cst = arith.constant 0xFF800000 : f32
    %4 = vector.shape_cast %3 : vector<1x256xi1> to vector<1x256xi1>
    %5 = vector.broadcast %4 : vector<1x256xi1> to vector<8x256xi1>
    %6 = vector.broadcast %cst : f32 to vector<8x256xf32>
    %7 = arith.select %5, %0, %6 : vector<8x256xi1>, vector<8x256xf32>
    %c0_3 = arith.constant 0 : index
    %c0_4 = arith.constant 0 : index
    %8 = vector.load %arg4[%c0_3, %c0_4] : memref<8x256xf32, #tpu.memory_space<vmem>>, vector<8x256xf32>
    tpu.vector_store %arg4[%c0_3, %c0_4], %7 {strides = array<i32>} : memref<8x256xf32, #tpu.memory_space<vmem>>, vector<8x256xf32>,
    return
  }
  func.func @transform_0(%arg0: i32, %arg1: i32) -> (i32, i32) {
    %c0_i32 = arith.constant 0 : i32
    return %arg1, %arg0 : i32, i32
  }
  func.func @transform_1(%arg0: i32, %arg1: i32) -> (i32, i32) {
    %c0_i32 = arith.constant 0 : i32
    %c0_i32_0 = arith.constant 0 : i32
    return %c0_i32, %arg0 : i32, i32
  }
  func.func @transform_2(%arg0: i32, %arg1: i32) -> (i32, i32) {
    %c0_i32 = arith.constant 0 : i32
    return %arg1, %arg0 : i32, i32
  }
}

</mosaic_0001>

<bundles_post_ra>
// kernel: tpu_custom_call.1
= control target key start
LH: loop header
LB: loop body
LE: loop exit
PB: predicated region body
PF: predicated region fallthrough
CT: control target
= control target key end

     0   :  { %7 = vsyncpa [#allocation3], 0  ;;  %s192_s0 = inlined_call_operand.hbm [shape: f32[8,256], index: 0, kind: input, shape index: {}]   ;;  %s193_s1 = inlined_call_operand.hbm [shape: s8[1,256], index: 1, kind: input, shape index: {}]   ;;  %s194_s2 = inlined_call_operand.hbm [shape: f32[8,256], index: 2, kind: output, shape index: {}]  }
   0x1   :  { %8 = vsyncpa [#allocation6], 0 }
   0x2   :  { %9 = vsyncpa [#allocation4], 0  ;;  %s15_s11 = sshll.u32 %s192_s0, 4  ;;  %s164_s12 = smov [#allocation2]   ;;  %s16_s11 = int_to_ptr.hbm [resolvable:$true] %s15_s11 }
   0x3   :  { %s17_s13 = sshll.u32 %s164_s12, 4  ;;  %s26_s16 = sshll.u32 %s193_s1, 4  ;;  %s18_s13 = int_to_ptr.vmem [resolvable:$true] %s17_s13  ;;  %s27_s16 = int_to_ptr.hbm [resolvable:$true] %s26_s16 }
   0x4   :  { %20 = dma.hbm_to_vmem [thread:$0]  %s16_s11, 256, %s18_s13, [#allocation3]  }
   0x5   :  { %s165_s17 = smov [#allocation5]  }
   0x6   :  { %s28_s18 = sshll.u32 %s165_s17, 4  ;;  %s29_s18 = int_to_ptr.vmem [resolvable:$true] %s28_s18 }
   0x7   :  { %31 = dma.hbm_to_vmem [thread:$0]  %s27_s16, 32, %s29_s18, [#allocation6]  }
   0x8   :  { %158 = dma.done.wait [#allocation3], 256  }
   0x9   :  { %159 = vsyncadd [#allocation3], 4294967040 }
   0xa   :  { %160 = dma.done.wait [#allocation6], 32  }
   0xb   :  { %161 = vsyncadd [#allocation6], 4294967264  ;;  %v44_v0 = vld [vmem:[#allocation5] sm:$0x3]  ;;  %v166_v1 = vmov 0   ;;  %v42_v9 = vld [vmem:[#allocation2] sm:$0xff] }
   0xc   :  { %vm45_vm0 = vnez %v44_v0  ;;  %v43_v11 = vld [vmem:[#allocation2 + $0x8] sm:$0xff]  ;;  %s167_s0 = smov [#allocation7]   ;;  %s71_s21 = sshll.u32 %s194_s2, 4  ;;  %s72_s21 = int_to_ptr.hbm [resolvable:$true] %s71_s21 }
   0xd   :  { %v46_v2 = vsel %vm45_vm0, 16843009, %v166_v1  ;;  %s69_s1 = sshll.u32 %s167_s0, 4  ;;  %s70_s1 = int_to_ptr.vmem [resolvable:$true] %s69_s1 }
   0xe   :  { %v47_v3 = vunpack.c.0.s8 %v46_v2 }
  0x10   :  { %vm48_vm1 = vcmp.ne.s32.totalorder %v47_v3, 0 }
  0x11   :  { %v49_v4 = vsel %vm48_vm1, 1, %v166_v1 }
  0x12   :  { %v50_v5 = vperm.slane %v49_v4, 0  ;;  %v51_v6 = vperm.slane %v49_v4, 4 }
  0x14   :  { %vm52_vm2 = vcmp.ne.s32.totalorder %v50_v5, 0  ;;  %vm53_vm3 = vcmp.ne.s32.totalorder %v51_v6, 0 }
  0x15   :  { %v54_v7 = vsel %vm52_vm2, 1, %v166_v1  ;;  %v55_v8 = vsel %vm53_vm3, 1, %v166_v1 }
  0x16   :  { %v56_v10 = vperm.slane %v54_v7, 0  ;;  %v57_v12 = vperm.slane %v55_v8, 0 }
  0x18   :  { %vm58_vm4 = vcmp.eq.s32.totalorder %v56_v10, 1  ;;  %vm59_vm5 = vcmp.eq.s32.totalorder %v57_v12, 1 }
  0x19   :  { %v60_v13 = vsel %vm58_vm4, %v42_v9, -inf  ;;  %v61_v14 = vsel %vm59_vm5, %v43_v11, -inf }
  0x1a   :  { %62 = vst [vmem:[#allocation7] sm:$0xff] %v60_v13 }
  0x1b   :  { %63 = vst [vmem:[#allocation7 + $0x8] sm:$0xff] %v61_v14 }
  0x1c   :  { %74 = dma.vmem_to_hbm [thread:$0]  %s70_s1, 256, %s72_s21, [#allocation4]  }
  0x1d   :  { %162 = dma.done.wait [#allocation4], 256  }
  0x1e   :  { %163 = vsyncadd [#allocation4], 4294967040 }
  0x1f   :  { %79 = vsyncpa [#allocation3], 1 }
  0x20   :  { %80 = vsyncpa [#allocation6], 1 }
  0x21   :  { %81 = vsyncpa [#allocation4], 1 }

</bundles_post_ra>
